<compile_context>
chip_gen: v6e
topology: v6e:2x2x1
jax: 0.10.0
libtpu: 0.0.40
codegen_flags: <defaults>
</compile_context>

<pallas_src>
import functools
import math

import jax
import jax.numpy as jnp
from jax.experimental import pallas as pl
from jax.experimental.pallas import tpu as pltpu

LOG_STD_MIN = -20.0
LOG_STD_MAX = 2.0
HALF_LOG_2PI = 0.5 * math.log(2.0 * math.pi)


def _round_up(x, m):
    return ((x + m - 1) // m) * m


def _choose_batch_tiling(batch, block_b):
    """Batch rides the lane axis -> 128-lane granularity.

    Prefers >= 2 grid steps when the batch is big enough so the "parallel"
    axis can shard across both TensorCores on v7x (no-op on 1-TC chips).
    """
    b_lane = _round_up(max(batch, 1), 128)
    tb = min(_round_up(block_b, 128), b_lane)
    if b_lane // tb < 2 and b_lane > 128:
        tb = _round_up(pl.cdiv(b_lane, 2), 128)
    b_pad = _round_up(b_lane, tb)
    return tb, b_pad


def actor_kernel(state_ref, w1_ref, b1_ref, w2_ref, b2_ref,
                 wh_ref, bh_ref, ah_ref, eps_ref,
                 act_ref, logp_ref, *, action_dim, ls_row):
    """Everything transposed: features on sublanes, batch on lanes."""
    A = action_dim

    # fc1 + relu : (H, S) @ (S, TB) -> (H, TB); bias broadcasts across lanes.
    x = jnp.dot(w1_ref[...], state_ref[...],
                preferred_element_type=jnp.float32) + b1_ref[...]
    x = jnp.maximum(x, 0.0)
    # fc2 + relu : (H, H) @ (H, TB) -> (H, TB)
    x = jnp.dot(w2_ref[...], x,
                preferred_element_type=jnp.float32) + b2_ref[...]
    x = jnp.maximum(x, 0.0)

    # Fused mean|log_std head: (2A_pad, H) @ (H, TB) -> (2A_pad, TB).
    # mean lives in rows [0, A), log_std in rows [ls_row, ls_row + A).
    heads = jnp.dot(wh_ref[...], x,
                    preferred_element_type=jnp.float32) + bh_ref[...]
    mean = heads[:A, :]
    log_std = jnp.clip(heads[ls_row:ls_row + A, :], LOG_STD_MIN, LOG_STD_MAX)
    std = jnp.exp(log_std)

    # Reparameterized sample: z = mean + std * eps (eps = 0 -> deterministic).
    eps = eps_ref[...]
    z = mean + std * eps
    action = jnp.tanh(z)

    # Normal(mean, std).log_prob(z) with (z - mean)/std == eps exactly, plus
    # the tanh-squash correction; only A real sublanes -> no masking needed.
    lp = (-0.5 * eps * eps - log_std - HALF_LOG_2PI
          - jnp.log(1.0 - action * action + 1e-6))
    logp_ref[...] = jnp.sum(lp, axis=0, keepdims=True)       # (1, TB)
    act_ref[...] = action * ah_ref[...]                      # (A, TB)


def pack_actor_params(params, action_high):
    """One-time repack of the Linear params for the transposed kernel.

    Call this when parameters change, NOT per forward pass.
    """
    w1, b1, w2, b2, wm, bm, ws, bs = params
    S, H = w1.shape
    A = wm.shape[-1]

    # fused head: mean weights in rows [0, A), log_std in rows [AR, AR + A)
    RH = _round_up(2 * A, 8)
    AR = RH // 2
    whT = jnp.zeros((RH, H), jnp.float32)
    whT = whT.at[:A, :].set(wm.T).at[AR:AR + A, :].set(ws.T)
    bhc = jnp.zeros((RH, 1), jnp.float32)
    bhc = bhc.at[:A, 0].set(bm.reshape(-1)).at[AR:AR + A, 0].set(bs.reshape(-1))

    return dict(
        w1T=jnp.asarray(w1.T, jnp.float32),
        b1c=jnp.asarray(b1, jnp.float32).reshape(H, 1),
        w2T=jnp.asarray(w2.T, jnp.float32),
        b2c=jnp.asarray(b2, jnp.float32).reshape(H, 1),
        whT=whT, bhc=bhc,
        ahc=jnp.asarray(action_high, jnp.float32).reshape(A, 1),
        state_dim=S, hidden_dim=H, action_dim=A, ls_row=AR,
    )


def actor_forward(state, packed, eps, *, block_b=2048):
    """Returns (scaled_action (B, A), log_prob (B, 1)).

    `eps` is the N(0,1) noise for rsample; pass zeros for deterministic mode.
    """
    B, S = state.shape
    A = packed["action_dim"]
    H = packed["hidden_dim"]
    RH = packed["whT"].shape[0]
    assert S == packed["state_dim"]

    TB, B_pad = _choose_batch_tiling(B, block_b)

    # Per-call layout plumbing: transpose + zero-pad batch up to B_pad lanes.
    state_T = jnp.zeros((S, B_pad), jnp.float32).at[:, :B].set(state.T)
    eps_T = jnp.zeros((A, B_pad), jnp.float32).at[:, :B].set(eps.T)

    col = lambda i: (0, i)   # batch-tiled arrays (tile along the lane axis)
    rep = lambda i: (0, 0)   # VMEM-resident weights

    act_T, logp_T = pl.pallas_call(
        functools.partial(actor_kernel, action_dim=A, ls_row=packed["ls_row"]),
        out_shape=(jax.ShapeDtypeStruct((A, B_pad), jnp.float32),
                   jax.ShapeDtypeStruct((1, B_pad), jnp.float32)),
        grid=(B_pad // TB,),
        in_specs=[
            pl.BlockSpec((S, TB), col),        # state (transposed)
            pl.BlockSpec((H, S), rep),         # w1^T
            pl.BlockSpec((H, 1), rep),         # b1 (column)
            pl.BlockSpec((H, H), rep),         # w2^T
            pl.BlockSpec((H, 1), rep),         # b2 (column)
            pl.BlockSpec((RH, H), rep),        # fused head weight (transposed)
            pl.BlockSpec((RH, 1), rep),        # fused head bias (column)
            pl.BlockSpec((A, 1), rep),         # action_high (column)
            pl.BlockSpec((A, TB), col),        # eps (transposed, narrow)
        ],
        out_specs=[
            pl.BlockSpec((A, TB), col),        # scaled_action (transposed)
            pl.BlockSpec((1, TB), col),        # log_prob (transposed)
        ],
        compiler_params=pltpu.CompilerParams(
            dimension_semantics=("parallel",)),
    )(state_T, packed["w1T"], packed["b1c"], packed["w2T"], packed["b2c"],
      packed["whT"], packed["bhc"], packed["ahc"], eps_T)

    return act_T[:, :B].T, logp_T[:, :B].T


def init_linear(key, fan_in, fan_out):
    # Mimics torch.nn.Linear default init (uniform +-1/sqrt(fan_in)).
    kw, kb = jax.random.split(key)
    bound = 1.0 / jnp.sqrt(jnp.float32(fan_in))
    w = jax.random.uniform(kw, (fan_in, fan_out), jnp.float32, -bound, bound)
    b = jax.random.uniform(kb, (1, fan_out), jnp.float32, -bound, bound)
    return w, b


def reference_forward(state, params, action_high, eps):
    w1, b1, w2, b2, wm, bm, ws, bs = params
    x = jnp.maximum(state @ w1 + b1, 0.0)
    x = jnp.maximum(x @ w2 + b2, 0.0)
    mean = x @ wm + bm
    log_std = jnp.clip(x @ ws + bs, LOG_STD_MIN, LOG_STD_MAX)
    std = jnp.exp(log_std)
    z = mean + std * eps
    action = jnp.tanh(z)
    lp = (-0.5 * ((z - mean) / std) ** 2 - log_std - 0.5 * jnp.log(2.0 * jnp.pi))
    lp = lp - jnp.log(1.0 - action ** 2 + 1e-6)
    return action * action_high, jnp.sum(lp, axis=-1, keepdims=True)


if __name__ == "__main__":
    B, STATE_DIM, HIDDEN_DIM, ACTION_DIM = 8, 16, 32, 4

    key = jax.random.PRNGKey(0)
    k_s, k1, k2, k3, k4, k_eps = jax.random.split(key, 6)

    state = jax.random.normal(k_s, (B, STATE_DIM), jnp.float32)
    w1, b1 = init_linear(k1, STATE_DIM, HIDDEN_DIM)
    w2, b2 = init_linear(k2, HIDDEN_DIM, HIDDEN_DIM)
    wm, bm = init_linear(k3, HIDDEN_DIM, ACTION_DIM)
    ws, bs = init_linear(k4, HIDDEN_DIM, ACTION_DIM)
    params = (w1, b1, w2, b2, wm, bm, ws, bs)

    action_high = jnp.full((1, ACTION_DIM), 2.0, jnp.float32)
    # rsample noise (deterministic=False path); randomness generated outside
    # the kernel.  eps = 0 reproduces the deterministic=True path exactly.
    eps = jax.random.normal(k_eps, (B, ACTION_DIM), jnp.float32)

    packed = pack_actor_params(params, action_high)   # hoisted, one-time repack
    scaled_action, log_prob = jax.block_until_ready(
        actor_forward(state, packed, eps))

    ref_action, ref_logp = reference_forward(state, params, action_high, eps)
    assert scaled_action.shape == (B, ACTION_DIM)
    assert log_prob.shape == (B, 1)
    assert jnp.allclose(scaled_action, ref_action, atol=1e-5, rtol=1e-5)
    assert jnp.allclose(log_prob, ref_logp, atol=1e-4, rtol=1e-4)

    print("KERNEL_OK")
</pallas_src>

<mosaic_0001>
module attributes {stable_mosaic.version = 11 : i64} {
  func.func @actor_kernel(%arg0: i32, %arg1: memref<16x128xf32, #tpu.memory_space<vmem>>, %arg2: memref<32x16xf32, #tpu.memory_space<vmem>>, %arg3: memref<32x1xf32, #tpu.memory_space<vmem>>, %arg4: memref<32x32xf32, #tpu.memory_space<vmem>>, %arg5: memref<32x1xf32, #tpu.memory_space<vmem>>, %arg6: memref<8x32xf32, #tpu.memory_space<vmem>>, %arg7: memref<8x1xf32, #tpu.memory_space<vmem>>, %arg8: memref<4x1xf32, #tpu.memory_space<vmem>>, %arg9: memref<4x128xf32, #tpu.memory_space<vmem>>, %arg10: memref<4x128xf32, #tpu.memory_space<vmem>>, %arg11: memref<1x128xf32, #tpu.memory_space<vmem>>) attributes {dimension_semantics = [#tpu.dimension_semantics<parallel>], iteration_bounds = array<i64: 1>, scalar_prefetch = 0 : i64, scratch_operands = 0 : i64, tpu.core_type = #tpu.core_type<tc>, window_params = [{transform_indices = @transform_0, window_bounds = array<i64: 16, 128>}, {pipeline_mode = #tpu.pipeline_mode<synchronous>, transform_indices = @transform_1, window_bounds = array<i64: 32, 16>}, {pipeline_mode = #tpu.pipeline_mode<synchronous>, transform_indices = @transform_2, window_bounds = array<i64: 32, 1>}, {pipeline_mode = #tpu.pipeline_mode<synchronous>, transform_indices = @transform_3, window_bounds = array<i64: 32, 32>}, {pipeline_mode = #tpu.pipeline_mode<synchronous>, transform_indices = @transform_4, window_bounds = array<i64: 32, 1>}, {pipeline_mode = #tpu.pipeline_mode<synchronous>, transform_indices = @transform_5, window_bounds = array<i64: 8, 32>}, {pipeline_mode = #tpu.pipeline_mode<synchronous>, transform_indices = @transform_6, window_bounds = array<i64: 8, 1>}, {pipeline_mode = #tpu.pipeline_mode<synchronous>, transform_indices = @transform_7, window_bounds = array<i64: 4, 1>}, {transform_indices = @transform_8, window_bounds = array<i64: 4, 128>}, {transform_indices = @transform_9, window_bounds = array<i64: 4, 128>}, {transform_indices = @transform_10, window_bounds = array<i64: 1, 128>}]} {
    %c0 = arith.constant 0 : index
    %c0_0 = arith.constant 0 : index
    %0 = vector.load %arg2[%c0, %c0_0] : memref<32x16xf32, #tpu.memory_space<vmem>>, vector<32x16xf32>
    %c0_1 = arith.constant 0 : index
    %c0_2 = arith.constant 0 : index
    %1 = vector.load %arg1[%c0_1, %c0_2] : memref<16x128xf32, #tpu.memory_space<vmem>>, vector<16x128xf32>
    %cst = arith.constant dense<0.000000e+00> : vector<32x128xf32>
    %2 = tpu.matmul %0, %1, %cst {dimension_numbers = #tpu.dot_dimension_numbers<[1], [0], [0], [1], [0, 0, 1, 1], [], []>} : vector<32x16xf32>, vector<16x128xf32>, vector<32x128xf32> -> vector<32x128xf32>
    %c0_3 = arith.constant 0 : index
    %c0_4 = arith.constant 0 : index
    %3 = vector.load %arg3[%c0_3, %c0_4] : memref<32x1xf32, #tpu.memory_space<vmem>>, vector<32x1xf32>
    %4 = vector.broadcast %3 : vector<32x1xf32> to vector<32x128xf32>
    %5 = arith.addf %2, %4 : vector<32x128xf32>
    %cst_5 = arith.constant 0.000000e+00 : f32
    %6 = vector.broadcast %cst_5 : f32 to vector<32x128xf32>
    %7 = arith.maximumf %5, %6 : vector<32x128xf32>
    %c0_6 = arith.constant 0 : index
    %c0_7 = arith.constant 0 : index
    %8 = vector.load %arg4[%c0_6, %c0_7] : memref<32x32xf32, #tpu.memory_space<vmem>>, vector<32x32xf32>
    %cst_8 = arith.constant dense<0.000000e+00> : vector<32x128xf32>
    %9 = tpu.matmul %8, %7, %cst_8 {dimension_numbers = #tpu.dot_dimension_numbers<[1], [0], [0], [1], [0, 0, 1, 1], [], []>} : vector<32x32xf32>, vector<32x128xf32>, vector<32x128xf32> -> vector<32x128xf32>
    %c0_9 = arith.constant 0 : index
    %c0_10 = arith.constant 0 : index
    %10 = vector.load %arg5[%c0_9, %c0_10] : memref<32x1xf32, #tpu.memory_space<vmem>>, vector<32x1xf32>
    %11 = vector.broadcast %10 : vector<32x1xf32> to vector<32x128xf32>
    %12 = arith.addf %9, %11 : vector<32x128xf32>
    %cst_11 = arith.constant 0.000000e+00 : f32
    %13 = vector.broadcast %cst_11 : f32 to vector<32x128xf32>
    %14 = arith.maximumf %12, %13 : vector<32x128xf32>
    %c0_12 = arith.constant 0 : index
    %c0_13 = arith.constant 0 : index
    %15 = vector.load %arg6[%c0_12, %c0_13] : memref<8x32xf32, #tpu.memory_space<vmem>>, vector<8x32xf32>
    %cst_14 = arith.constant dense<0.000000e+00> : vector<8x128xf32>
    %16 = tpu.matmul %15, %14, %cst_14 {dimension_numbers = #tpu.dot_dimension_numbers<[1], [0], [0], [1], [0, 0, 1, 1], [], []>} : vector<8x32xf32>, vector<32x128xf32>, vector<8x128xf32> -> vector<8x128xf32>
    %c0_15 = arith.constant 0 : index
    %c0_16 = arith.constant 0 : index
    %17 = vector.load %arg7[%c0_15, %c0_16] : memref<8x1xf32, #tpu.memory_space<vmem>>, vector<8x1xf32>
    %18 = vector.broadcast %17 : vector<8x1xf32> to vector<8x128xf32>
    %19 = arith.addf %16, %18 : vector<8x128xf32>
    %20 = vector.extract_strided_slice %19 {offsets = [0, 0], sizes = [4, 128], strides = [1, 1]} : vector<8x128xf32> to vector<4x128xf32>
    %21 = vector.extract_strided_slice %19 {offsets = [4, 0], sizes = [4, 128], strides = [1, 1]} : vector<8x128xf32> to vector<4x128xf32>
    %cst_17 = arith.constant -2.000000e+01 : f32
    %cst_18 = arith.constant 2.000000e+00 : f32
    %22 = vector.broadcast %cst_17 : f32 to vector<4x128xf32>
    %23 = arith.maximumf %22, %21 : vector<4x128xf32>
    %24 = vector.broadcast %cst_18 : f32 to vector<4x128xf32>
    %25 = arith.minimumf %24, %23 : vector<4x128xf32>
    %26 = math.exp %25 : vector<4x128xf32>
    %c0_19 = arith.constant 0 : index
    %c0_20 = arith.constant 0 : index
    %27 = vector.load %arg9[%c0_19, %c0_20] : memref<4x128xf32, #tpu.memory_space<vmem>>, vector<4x128xf32>
    %28 = arith.mulf %26, %27 : vector<4x128xf32>
    %29 = arith.addf %20, %28 : vector<4x128xf32>
    %30 = math.tanh %29 : vector<4x128xf32>
    %cst_21 = arith.constant -5.000000e-01 : f32
    %31 = vector.broadcast %cst_21 : f32 to vector<4x128xf32>
    %32 = arith.mulf %31, %27 : vector<4x128xf32>
    %33 = arith.mulf %32, %27 : vector<4x128xf32>
    %34 = arith.subf %33, %25 : vector<4x128xf32>
    %cst_22 = arith.constant 0.918938517 : f32
    %35 = vector.broadcast %cst_22 : f32 to vector<4x128xf32>
    %36 = arith.subf %34, %35 : vector<4x128xf32>
    %37 = arith.mulf %30, %30 : vector<4x128xf32>
    %cst_23 = arith.constant 1.000000e+00 : f32
    %38 = vector.broadcast %cst_23 : f32 to vector<4x128xf32>
    %39 = arith.subf %38, %37 : vector<4x128xf32>
    %cst_24 = arith.constant 9.99999997E-7 : f32
    %40 = vector.broadcast %cst_24 : f32 to vector<4x128xf32>
    %41 = arith.addf %39, %40 : vector<4x128xf32>
    %42 = math.log %41 : vector<4x128xf32>
    %43 = arith.subf %36, %42 : vector<4x128xf32>
    %cst_25 = arith.constant dense<0.000000e+00> : vector<128xf32>
    %44 = vector.multi_reduction <add>, %43, %cst_25 [0] : vector<4x128xf32> to vector<128xf32>
    %45 = vector.shape_cast %44 : vector<128xf32> to vector<1x128xf32>
    %c0_26 = arith.constant 0 : index
    %c0_27 = arith.constant 0 : index
    %46 = vector.load %arg11[%c0_26, %c0_27] : memref<1x128xf32, #tpu.memory_space<vmem>>, vector<1x128xf32>
    tpu.vector_store %arg11[%c0_26, %c0_27], %45 {strides = array<i32>} : memref<1x128xf32, #tpu.memory_space<vmem>>, vector<1x128xf32>,
    %c0_28 = arith.constant 0 : index
    %c0_29 = arith.constant 0 : index
    %47 = vector.load %arg8[%c0_28, %c0_29] : memref<4x1xf32, #tpu.memory_space<vmem>>, vector<4x1xf32>
    %48 = vector.broadcast %47 : vector<4x1xf32> to vector<4x128xf32>
    %49 = arith.mulf %30, %48 : vector<4x128xf32>
    %c0_30 = arith.constant 0 : index
    %c0_31 = arith.constant 0 : index
    %50 = vector.load %arg10[%c0_30, %c0_31] : memref<4x128xf32, #tpu.memory_space<vmem>>, vector<4x128xf32>
    tpu.vector_store %arg10[%c0_30, %c0_31], %49 {strides = array<i32>} : memref<4x128xf32, #tpu.memory_space<vmem>>, vector<4x128xf32>,
    return
  }
  func.func @transform_0(%arg0: i32) -> (i32, i32) {
    %c0_i32 = arith.constant 0 : i32
    %c0_i32_0 = arith.constant 0 : i32
    return %c0_i32, %arg0 : i32, i32
  }
  func.func @transform_1(%arg0: i32) -> (i32, i32) {
    %c0_i32 = arith.constant 0 : i32
    %c0_i32_0 = arith.constant 0 : i32
    %c0_i32_1 = arith.constant 0 : i32
    return %c0_i32, %c0_i32_0 : i32, i32
  }
  func.func @transform_2(%arg0: i32) -> (i32, i32) {
    %c0_i32 = arith.constant 0 : i32
    %c0_i32_0 = arith.constant 0 : i32
    %c0_i32_1 = arith.constant 0 : i32
    return %c0_i32, %c0_i32_0 : i32, i32
  }
  func.func @transform_3(%arg0: i32) -> (i32, i32) {
    %c0_i32 = arith.constant 0 : i32
    %c0_i32_0 = arith.constant 0 : i32
    %c0_i32_1 = arith.constant 0 : i32
    return %c0_i32, %c0_i32_0 : i32, i32
  }
  func.func @transform_4(%arg0: i32) -> (i32, i32) {
    %c0_i32 = arith.constant 0 : i32
    %c0_i32_0 = arith.constant 0 : i32
    %c0_i32_1 = arith.constant 0 : i32
    return %c0_i32, %c0_i32_0 : i32, i32
  }
  func.func @transform_5(%arg0: i32) -> (i32, i32) {
    %c0_i32 = arith.constant 0 : i32
    %c0_i32_0 = arith.constant 0 : i32
    %c0_i32_1 = arith.constant 0 : i32
    return %c0_i32, %c0_i32_0 : i32, i32
  }
  func.func @transform_6(%arg0: i32) -> (i32, i32) {
    %c0_i32 = arith.constant 0 : i32
    %c0_i32_0 = arith.constant 0 : i32
    %c0_i32_1 = arith.constant 0 : i32
    return %c0_i32, %c0_i32_0 : i32, i32
  }
  func.func @transform_7(%arg0: i32) -> (i32, i32) {
    %c0_i32 = arith.constant 0 : i32
    %c0_i32_0 = arith.constant 0 : i32
    %c0_i32_1 = arith.constant 0 : i32
    return %c0_i32, %c0_i32_0 : i32, i32
  }
  func.func @transform_8(%arg0: i32) -> (i32, i32) {
    %c0_i32 = arith.constant 0 : i32
    %c0_i32_0 = arith.constant 0 : i32
    return %c0_i32, %arg0 : i32, i32
  }
  func.func @transform_9(%arg0: i32) -> (i32, i32) {
    %c0_i32 = arith.constant 0 : i32
    %c0_i32_0 = arith.constant 0 : i32
    return %c0_i32, %arg0 : i32, i32
  }
  func.func @transform_10(%arg0: i32) -> (i32, i32) {
    %c0_i32 = arith.constant 0 : i32
    %c0_i32_0 = arith.constant 0 : i32
    return %c0_i32, %arg0 : i32, i32
  }
}

</mosaic_0001>

<bundles_post_ra>
// kernel: tpu_custom_call.1
= control target key start
LH: loop header
LB: loop body
LE: loop exit
PB: predicated region body
PF: predicated region fallthrough
CT: control target
= control target key end

     0   :  { %16 = vsyncpa [#allocation3], 0  ;;  %vm66_vm0 = vcmask 130048   ;;  %v571_v4 = vmov 0   ;;  %s712_s0 = inlined_call_operand.vmem [shape: f32[16,128], index: 0, kind: input, shape index: {}]   ;;  %s713_s1 = inlined_call_operand.vmem [shape: f32[32,16], index: 1, kind: input, shape index: {}]   ;;  %s714_s2 = inlined_call_operand.vmem [shape: f32[32,1], index: 2, kind: input, shape index: {}]   ;;  %s715_s3 = inlined_call_operand.vmem [shape: f32[32,32], index: 3, kind: input, shape index: {}]   ;;  %s716_s4 = inlined_call_operand.vmem [shape: f32[32,1], index: 4, kind: input, shape index: {}]   ;;  %s717_s5 = inlined_call_operand.vmem [shape: f32[8,32], index: 5, kind: input, shape index: {}]   ;;  %s718_s6 = inlined_call_operand.vmem [shape: f32[8,1], index: 6, kind: input, shape index: {}]   ;;  %s719_s7 = inlined_call_operand.vmem [shape: f32[4,1], index: 7, kind: input, shape index: {}]   ;;  %s720_s8 = inlined_call_operand.vmem [shape: f32[4,128], index: 8, kind: input, shape index: {}]   ;;  %s721_s9 = inlined_call_operand.hbm [shape: f32[4,128], index: 9, kind: output, shape index: {0}]   ;;  %s722_s10 = inlined_call_operand.hbm [shape: f32[1,128], index: 10, kind: output, shape index: {1}]  }
   0x1   :  { %v41_v0 = vld [vmem:[%s712_s0 + $0x8] sm:$0xff]  ;;  %v40_v1 = vld [vmem:[%s712_s0] sm:$0xff]  ;;  %519 = vset.pattern.permute.xlu0 %v571_v4  ;;  %v45_v5 = vld [vmem:[%s714_s2 + $0x18] sm:$0xff]  ;;  %520 = vset.pattern.permute.xlu1 %v571_v4 }
   0x2   :  { %v36_v2 = vld [vmem:[%s713_s1] sm:$0xff]  ;;  %479 = vmatprep.subr.mxu0 %v41_v0  ;;  %v37_v3 = vld [vmem:[%s713_s1 + $0x8] sm:$0xff]  ;;  %v38_v7 = vld [vmem:[%s713_s1 + $0x10] sm:$0xff]  ;;  %63 = vperm.xlu0 %519, %v45_v5  }
   0x3   :  { %483 = vmatprep.mubr.msk.f32.mxu0 %vm66_vm0, %v36_v2  ;;  %480 = vmatpush3.msra.mxu0 %v41_v0  ;;  %v43_v6 = vld [vmem:[%s714_s2 + $0x8] sm:$0xff]  ;;  %v44_v8 = vld [vmem:[%s714_s2 + $0x10] sm:$0xff] }
   0x4   :  { %481 = vmatprep.subr.mxu0 %v40_v1  ;;  %53 = vperm.xlu1 %520, %v43_v6  }
   0x5   :  { %482 = vmatpush3.msra.mxu0 %v40_v1 }
   0x6   :  { %484 = vmatmul.mubr.msk.f32.vlgmr.msra.gmra.mxu0 %vm66_vm0, %v37_v3 }
   0x7   :  { %17 = vsyncpa [#allocation5], 0  ;;  %486 = vmatprep.mubr.msk.f32.mxu0 %vm66_vm0, %v38_v7  ;;  %v39_v9 = vld [vmem:[%s713_s1 + $0x18] sm:$0xff]  ;;  %v42_v10 = vld [vmem:[%s714_s2] sm:$0xff]  ;;  %58 = vperm.xlu0 %519, %v44_v8   ;;  %vm196_vm1 = vcmask 261120   ;;  %v572_v37 = vmov 0.0  }
   0x8   :  { %v175_v11 = vld [vmem:[%s716_s4 + $0x18] sm:$0xff]  ;;  %48 = vperm.xlu1 %520, %v42_v10   ;;  %v174_v12 = vld [vmem:[%s716_s4 + $0x10] sm:$0xff]  ;;  %v173_v13 = vld [vmem:[%s716_s4 + $0x8] sm:$0xff]  ;;  %503 = vmatprep.subr.mxu0 %v572_v37  ;;  %vm573_vm2 = vmmov 0  }
   0x9   :  { %v172_v14 = vld [vmem:[%s716_s4] sm:$0xff]  ;;  %v169_v34 = vld [vmem:[%s715_s3 + $0x8] sm:$0xff]  ;;  %v170_v35 = vld [vmem:[%s715_s3 + $0x10] sm:$0xff] }
   0xa   :  { %487 = vmatmul.mubr.msk.f32.gmra.mxu0 %vm66_vm0, %v39_v9  ;;  %v299_v15 = vld [vmem:[%s718_s6] sm:$0xff]  ;;  %v171_v36 = vld [vmem:[%s715_s3 + $0x18] sm:$0xff] }
   0xb   :  { %193 = vperm.xlu0 %519, %v175_v11   ;;  %v414_v16 = vld [vmem:[%s719_s7] sm:$0xf]  ;;  %511 = vmatprep.mubr.msk.f32.mxu0 %vm573_vm2, %v572_v37 }
   0xc   :  { %188 = vperm.xlu1 %520, %v174_v12   ;;  %v168_v17 = vld [vmem:[%s715_s3] sm:$0xff] }
   0xd   :  { %497 = vmatprep.mubr.msk.f32.mxu1 %vm196_vm1, %v168_v17  ;;  %v298_v54 = vld [vmem:[%s717_s5] sm:$0xff]  ;;  %s574_s5 = smov [#allocation2]  }
   0xe   :  { %v382_v62 = vld [vmem:[%s720_s8] sm:$0xf]  ;;  %s428_s29 = sshll.u32 %s574_s5, 4  ;;  %s429_s29 = int_to_ptr.vmem [resolvable:$true] %s428_s29 }
   0xf   :  { %183 = vperm.xlu0 %519, %v173_v13   ;;  %v384_v63 = vrot.slane %v382_v62, 4  ;;  %s527_s30 = scalar_lea.vmem %s429_s29, 64  ;;  %p532_p1 = scmp.lt.s32.totalorder %s429_s29, %s429_s29 }
  0x10   :  { %178 = vperm.xlu1 %520, %v172_v14   ;;  %p528_p0 = scmp.ne.s32.totalorder %s429_s29, %s527_s30  ;;  %p533_p2 = scmp.lt.s32.totalorder %s527_s30, %s527_s30 }
  0x12   :  { %p534_p3 = por %p533_p2, %p532_p1 }
  0x13   :  { %302 = vperm.xlu0 %519, %v299_v15  }
  0x14   :  { %417 = vperm.xlu1 %520, %v414_v16   ;;  %p535_p4 = pnand %p534_p3, %p528_p0 }
  0x7d   :  { %v64_v18 = vpop.permute.xlu0 %63 }
  0x7f   :  { %v54_v20 = vpop.permute.xlu1 %53 }
  0x82   :  { %v59_v24 = vpop.permute.xlu0 %58 }
  0x83   :  { %v49_v29 = vpop.permute.xlu1 %48 }
  0x86   :  { %v194_v38 = vpop.permute.xlu0 %193 }
  0x87   :  { %v189_v40 = vpop.permute.xlu1 %188 }
  0x8a   :  { %v184_v44 = vpop.permute.xlu0 %183 }
  0x8b   :  { %v179_v49 = vpop.permute.xlu1 %178 }
  0x8e   :  { %v303_v55 = vpop.permute.xlu0 %302 }
  0x8f   :  { %v418_v5 = vpop.permute.xlu1 %417 }
  0xc6   :  { %v485_v19 = vpop.f32.mrf.mxu0 }
  0xc7   :  { %v151_v26 = vadd.f32 %v485_v19, %v54_v20 }
  0xc8   :  { %v145_v21 = vpop.f32.mrf.mxu0 }
  0xc9   :  { %v146_v30 = vadd.f32 %v145_v21, %v49_v29  ;;  %v165_v32 = vmax.f32 %v151_v26, 0.0 }
  0xca   :  { %v488_v22 = vpop.f32.mrf.mxu0 }
  0xcb   :  { %v161_v23 = vadd.f32 %v488_v22, %v64_v18  ;;  %v164_v33 = vmax.f32 %v146_v30, 0.0 }
  0xcc   :  { %v155_v25 = vpop.f32.mrf.mxu0 }
  0xcd   :  { %v167_v27 = vmax.f32 %v161_v23, 0.0  ;;  %v156_v28 = vadd.f32 %v155_v25, %v59_v24 }
  0xcf   :  { %v166_v31 = vmax.f32 %v156_v28, 0.0  ;;  %489 = vmatprep.subr.mxu1 %v167_v27 }
  0xd0   :  { %490 = vmatpush3.msra.mxu1 %v167_v27 }
  0xd1   :  { %491 = vmatprep.subr.mxu1 %v166_v31 }
  0xd2   :  { %492 = vmatpush3.msra.mxu1 %v166_v31 }
  0xd3   :  { %493 = vmatprep.subr.mxu1 %v165_v32 }
  0xd4   :  { %494 = vmatpush3.msra.mxu1 %v165_v32 }
  0xd5   :  { %495 = vmatprep.subr.mxu1 %v164_v33 }
  0xd6   :  { %496 = vmatpush3.msra.mxu1 %v164_v33 }
  0xd7   :  { %498 = vmatmul.mubr.msk.f32.vlgmr.msra.gmra.mxu1 %vm196_vm1, %v169_v34 }
  0xd8   :  { %500 = vmatprep.mubr.msk.f32.mxu1 %vm196_vm1, %v170_v35 }
  0xdb   :  { %501 = vmatmul.mubr.msk.f32.gmra.mxu1 %vm196_vm1, %v171_v36 }
 0x197   :  { %v499_v39 = vpop.f32.mrf.mxu1 }
 0x198   :  { %v281_v46 = vadd.f32 %v499_v39, %v184_v44 }
 0x199   :  { %v275_v41 = vpop.f32.mrf.mxu1 }
 0x19a   :  { %v276_v50 = vadd.f32 %v275_v41, %v179_v49  ;;  %v295_v52 = vmax.f32 %v281_v46, 0.0 }
 0x19b   :  { %v502_v42 = vpop.f32.mrf.mxu1 }
 0x19c   :  { %v291_v43 = vadd.f32 %v502_v42, %v194_v38  ;;  %v294_v53 = vmax.f32 %v276_v50, 0.0 }
 0x19d   :  { %v285_v45 = vpop.f32.mrf.mxu1 }
 0x19e   :  { %v297_v47 = vmax.f32 %v291_v43, 0.0  ;;  %v286_v48 = vadd.f32 %v285_v45, %v189_v40 }
 0x1a0   :  { %v296_v51 = vmax.f32 %v286_v48, 0.0  ;;  %504 = vmatpush3.msra.mxu0 %v297_v47 }
 0x1a1   :  { %505 = vmatprep.subr.mxu0 %v572_v37 }
 0x1a2   :  { %506 = vmatpush3.msra.mxu0 %v296_v51 }
 0x1a3   :  { %507 = vmatprep.subr.mxu0 %v572_v37 }
 0x1a4   :  { %508 = vmatpush3.msra.mxu0 %v295_v52 }
 0x1a5   :  { %509 = vmatprep.subr.mxu0 %v572_v37 }
 0x1a6   :  { %510 = vmatpush3.msra.mxu0 %v294_v53 }
 0x1a7   :  { %512 = vmatmul.mubr.msk.f32.vlgmr.msra.gmra.mxu0 %vm196_vm1, %v298_v54 }
 0x267   :  { %v374_v56 = vpop.f32.mrf.mxu0 }
 0x268   :  { %v375_v57 = vadd.f32 %v374_v56, %v303_v55 }
 0x269   :  { %v513_v58 = vpop.f32.mrf.mxu0 }
 0x26a   :  { %v378_v59 = vmax.f32 %v375_v57, -20.0 }
 0x26c   :  { %v379_v60 = vmin.f32 %v378_v59, 2.0 }
 0x26e   :  { %v380_v61 = vmul.f32 1.442695, %v379_v60 }
 0x270   :  { %521 = vpow2.f32 %v380_v61 }
 0x27d   :  { %v522_v0 = vpop.eup %521 }
 0x27e   :  { %v386_v1 = vmul.f32 %v522_v0, %v384_v63 }
 0x280   :  { %v388_v2 = vrot.slane %v386_v1, 4 }
 0x282   :  { %v390_v3 = vadd.f32 %v388_v2, %v375_v57 }
 0x284   :  { %523 = vtanh.f32 %v390_v3 }
 0x291   :  { %v524_v4 = vpop.eup %523 }
 0x292   :  { %v420_v6 = vmul.f32 %v524_v4, %v418_v5  ;;  %v399_v7 = vmul.f32 %v524_v4, %v524_v4 }
 0x294   :  { %421 = vst [vmem:[#allocation2] sm:$0xf] %v420_v6  ;;  %v400_v8 = vsub.f32 1.0, %v399_v7 }
 0x295   :  { %538 = shalt.err (!%p535_p4)
}
 0x296   :  { %431 = dma.vmem_to_hbm [thread:$0]  %s429_s29, 64, %s721_s9, [#allocation3]   ;;  %v401_v9 = vadd.f32 1e-06, %v400_v8  ;;  %v392_v10 = vmul.f32 -0.5, %v382_v62  ;;  %v395_v12 = vrot.slane %v379_v60, 4 }
 0x297   :  { %vm405_vm3 = vcmask 1043456   ;;  %s575_s12 = smov [#allocation4]  }
 0x298   :  { %525 = vlog2.f32 %v401_v9  ;;  %v393_v11 = vmul.f32 %v392_v10, %v382_v62  ;;  %s438_s13 = sshll.u32 %s575_s12, 4  ;;  %s439_s13 = int_to_ptr.vmem [resolvable:$true] %s438_s13 }
 0x299   :  { %s547_s9 = scalar_lea.vmem %s439_s13, 16  ;;  %s551_s14 = scalar_lea.vmem %s439_s13, 32 }
 0x29a   :  { %v397_v13 = vsub.f32 %v393_v11, %v395_v12  ;;  %p548_p5 = scmp.ne.s32.totalorder %s439_s13, %s547_s9  ;;  %p552_p6 = scmp.lt.s32.totalorder %s439_s13, %s439_s13 }
 0x29b   :  { %p553_p7 = scmp.lt.s32.totalorder %s551_s14, %s547_s9 }
 0x29c   :  { %v459_v15 = vadd.f32 -0.9189385, %v397_v13 }
 0x29d   :  { %p554_p8 = por %p553_p7, %p552_p6 }
 0x29f   :  { %p555_p9 = pnand %p554_p8, %p548_p5 }
 0x2a5   :  { %v526_v14 = vpop.eup %525 }
 0x2a6   :  { %v403_v16 = vmul.f32 0.6931472, %v526_v14 }
 0x2a8   :  { %v404_v17 = vsub.f32 %v459_v15, %v403_v16 }
 0x2aa   :  { %v406_v18 = vsel %vm405_vm3, %v404_v17, 0.0 }
 0x2ab   :  { %v407_v19 = vrot.slane %v406_v18, 4 }
 0x2ad   :  { %v408_v20 = vadd.f32 %v407_v19, %v406_v18 }
 0x2af   :  { %v409_v21 = vrot.slane %v408_v20, 2 }
 0x2b1   :  { %v410_v22 = vadd.f32 %v409_v21, %v408_v20 }
 0x2b3   :  { %v411_v23 = vrot.slane %v410_v22, 1 }
 0x2b5   :  { %v412_v24 = vadd.f32 %v411_v23, %v410_v22 }
 0x2b7   :  { %413 = vst [vmem:[#allocation4] sm:$0x1] %v412_v24 }
 0x2b8   :  { %558 = shalt.err (!%p555_p9)
}
 0x2b9   :  { %441 = dma.vmem_to_hbm [thread:$0]  %s439_s13, 16, %s722_s10, [#allocation5]  }
 0x2ba   :  { %567 = dma.done.wait [#allocation3], 64  }
 0x2bb   :  { %568 = vsyncadd [#allocation3], 4294967232 }
 0x2bc   :  { %569 = dma.done.wait [#allocation5], 16  }
 0x2bd   :  { %570 = vsyncadd [#allocation5], 4294967280 }
 0x2be   :  { %448 = vsyncpa [#allocation3], 1 }
 0x2bf   :  { %449 = vsyncpa [#allocation5], 1 }

</bundles_post_ra>
